<compile_context>
chip_gen: v5e
topology: v5e:2x2
jax: 0.10.0
libtpu: 0.0.40
codegen_flags: <defaults>
</compile_context>

<pallas_src>
import math

import jax
import jax.numpy as jnp
from jax.experimental import pallas as pl
from jax.experimental.pallas import tpu as pltpu


def _round_up(x, m):
    return ((x + m - 1) // m) * m


# ----------------------------------------------------------------------------------
# Kernel 1: projection  h = x @ W ;  scores = h @ [a_dst | a_src]   (row-tiled)
# ----------------------------------------------------------------------------------
def _gat_proj_kernel(x_ref, w_ref, att_ref, h_ref, scores_ref):
    h = jnp.dot(x_ref[...], w_ref[...], preferred_element_type=jnp.float32)  # [TM, Fout]
    h_ref[...] = h
    # attention scalars on the MXU: column 0 = <h, att_dst>, column 1 = <h, att_src>
    scores_ref[...] = jnp.dot(h, att_ref[...], preferred_element_type=jnp.float32)  # [TM, 2]


def gat_project(x, w, att, *, tm):
    n_pad, f_in = x.shape
    f_out = w.shape[1]
    grid = (n_pad // tm,)
    return pl.pallas_call(
        _gat_proj_kernel,
        out_shape=(
            jax.ShapeDtypeStruct((n_pad, f_out), jnp.float32),
            jax.ShapeDtypeStruct((n_pad, 2), jnp.float32),
        ),
        grid_spec=pltpu.PrefetchScalarGridSpec(
            num_scalar_prefetch=0,
            grid=grid,
            in_specs=[
                pl.BlockSpec((tm, f_in), lambda i: (i, 0)),
                pl.BlockSpec((f_in, f_out), lambda i: (0, 0)),   # resident across grid
                pl.BlockSpec((f_out, 2), lambda i: (0, 0)),      # resident across grid
            ],
            out_specs=(
                pl.BlockSpec((tm, f_out), lambda i: (i, 0)),
                pl.BlockSpec((tm, 2), lambda i: (i, 0)),
            ),
        ),
        compiler_params=pltpu.CompilerParams(
            dimension_semantics=("parallel",),
            vmem_limit_bytes=32 * 1024 * 1024,
        ),
    )(x, w, att)


# ----------------------------------------------------------------------------------
# Kernel 2: masked-softmax attention + aggregation, tiled (target rows x source cols)
# with an online (flash-style) softmax.  adj is int8 (0/1).
# ----------------------------------------------------------------------------------
def _gat_attn_kernel(adst_ref, asrc_ref, adj_ref, h_ref, b_ref, o_ref,
                     m_sc, l_sc, acc_sc):
    j = pl.program_id(1)

    @pl.when(j == 0)
    def _():
        m_sc[...] = jnp.full_like(m_sc, -1e30)
        l_sc[...] = jnp.zeros_like(l_sc)
        acc_sc[...] = jnp.zeros_like(acc_sc)

    # int8 {0,1} -> f32 mask (standard dequant-style widen on the VPU).
    mask = adj_ref[...].astype(jnp.float32) > 0.0             # [TM, TN] bool
    # e[i, j] = leaky_relu(a_dst[i] + a_src[j], 0.2): pure broadcast add, no transpose
    e = adst_ref[...] + asrc_ref[...]                         # [TM,1] + [1,TN] -> [TM,TN]
    e = jnp.where(e > 0, e, 0.2 * e)
    e = jnp.where(mask, e, -1e30)                             # sentinel for the running max

    m_prev = m_sc[...]
    m_new = jnp.maximum(m_prev, jnp.max(e, axis=-1, keepdims=True))
    corr = jnp.exp(m_prev - m_new)
    # single masking mechanism on p: exact zeros on non-edges, safe even for rows with
    # no edge seen yet in this column sweep (padded rows).
    p = jnp.where(mask, jnp.exp(e - m_new), 0.0)

    l_sc[...] = corr * l_sc[...] + jnp.sum(p, axis=-1, keepdims=True)
    acc_sc[...] = corr * acc_sc[...] + jnp.dot(p, h_ref[...],
                                               preferred_element_type=jnp.float32)
    m_sc[...] = m_new

    @pl.when(j == pl.num_programs(1) - 1)
    def _():
        denom = jnp.maximum(l_sc[...], 1e-30)                 # guard padded rows (denom==0)
        out = acc_sc[...] * pl.reciprocal(denom, approx=True) + b_ref[...]
        o_ref[...] = jnp.maximum(out, 0.0)                    # module activation = ReLU


def gat_attention(a_dst, a_src_row, adj, h, bias, *, tm, tn):
    n_pad, f_out = h.shape
    grid = (n_pad // tm, n_pad // tn)
    return pl.pallas_call(
        _gat_attn_kernel,
        out_shape=jax.ShapeDtypeStruct((n_pad, f_out), jnp.float32),
        grid_spec=pltpu.PrefetchScalarGridSpec(
            num_scalar_prefetch=0,
            grid=grid,
            in_specs=[
                pl.BlockSpec((tm, 1), lambda i, j: (i, 0)),      # a_dst column slice
                pl.BlockSpec((1, tn), lambda i, j: (0, j)),      # a_src lane-major row
                pl.BlockSpec((tm, tn), lambda i, j: (i, j)),     # adjacency tile (int8)
                pl.BlockSpec((tn, f_out), lambda i, j: (j, 0)),  # source features
                pl.BlockSpec((1, f_out), lambda i, j: (0, 0)),   # bias (resident)
            ],
            out_specs=pl.BlockSpec((tm, f_out), lambda i, j: (i, 0)),
            scratch_shapes=[
                pltpu.VMEM((tm, 1), jnp.float32),      # running max
                pltpu.VMEM((tm, 1), jnp.float32),      # running denom
                pltpu.VMEM((tm, f_out), jnp.float32),  # accumulator
            ],
        ),
        compiler_params=pltpu.CompilerParams(
            dimension_semantics=("parallel", "arbitrary"),
            vmem_limit_bytes=32 * 1024 * 1024,
        ),
    )(a_dst, a_src_row, adj, h, bias)


# ----------------------------------------------------------------------------------
# Graph / parameter helpers and the Encoder forward
# ----------------------------------------------------------------------------------
def build_adjacency(edge_index, num_nodes, n_pad):
    """adj[dst, src] = 1 for each edge src->dst, plus self-loops; int8; zero padding."""
    src = edge_index[0]
    dst = edge_index[1]
    adj = jnp.zeros((n_pad, n_pad), dtype=jnp.int8)
    adj = adj.at[dst, src].set(jnp.int8(1))
    idx = jnp.arange(num_nodes)
    adj = adj.at[idx, idx].set(jnp.int8(1))   # PyG GATConv add_self_loops=True
    return adj


def init_gat_params(key, in_channels, out_channels, k=2):
    """Deterministic params for k GATConv(heads=1) layers: (W, att_src, att_dst, bias)."""
    params = []
    dims = [(in_channels, out_channels)] + [(out_channels, out_channels)] * (k - 1)
    for (fi, fo) in dims:
        key, k1, k2, k3 = jax.random.split(key, 4)
        scale = 1.0 / jnp.sqrt(jnp.float32(fi))
        w = jax.random.normal(k1, (fi, fo), dtype=jnp.float32) * scale
        a_src = jax.random.normal(k2, (1, fo), dtype=jnp.float32) * 0.1
        a_dst = jax.random.normal(k3, (1, fo), dtype=jnp.float32) * 0.1
        b = jnp.zeros((1, fo), dtype=jnp.float32)
        params.append((w, a_src, a_dst, b))
    return params


def encoder_forward(x, edge_index, params, *, tm=256, tn=512):
    """Encoder.forward: k-layer GAT (ReLU between layers), then .view(-1, F_out).

    tm / tn are the (target-row, source-col) tile sizes: tm % 32 == 0 (int8 sublane
    packing), tn % 128 == 0 (lane dim).  Suggested: v7x tm=256/tn=512 (64 MiB VMEM);
    v5e/v6e can go larger (tm=512-1024).
    """
    assert tm % 32 == 0 and tn % 128 == 0
    n = x.shape[0]
    n_pad = _round_up(n, math.lcm(tm, tn))
    adj = build_adjacency(edge_index, n, n_pad)
    h = jnp.pad(x, ((0, n_pad - n), (0, 0)))
    for (w, a_src, a_dst, b) in params:
        att = jnp.concatenate([a_dst.T, a_src.T], axis=1)       # [Fout, 2]
        hp, scores = gat_project(h, w, att, tm=tm)
        a_dst_col = scores[:, 0:1]                               # [n_pad, 1]
        a_src_row = scores[:, 1:2].reshape(1, n_pad)             # [1, n_pad] lane-major
        h = gat_attention(a_dst_col, a_src_row, adj, hp, b, tm=tm, tn=tn)
    out = h[:n]
    # representations.view(-1, representations.size(-1)) -- already 2D, no-op reshape
    return out.reshape(-1, out.shape[-1])


def encoder_reference(x, edge_index, params):
    """Pure-JAX reference (dense masked softmax), for self-validation."""
    n = x.shape[0]
    adj = jnp.zeros((n, n), jnp.float32).at[edge_index[1], edge_index[0]].set(1.0)
    adj = adj.at[jnp.arange(n), jnp.arange(n)].set(1.0)
    h = x
    for (w, a_src, a_dst, b) in params:
        hp = h @ w
        s_src = jnp.sum(hp * a_src, axis=-1)
        s_dst = jnp.sum(hp * a_dst, axis=-1)
        e = s_dst[:, None] + s_src[None, :]
        e = jnp.where(e > 0, e, 0.2 * e)
        e = jnp.where(adj > 0, e, -jnp.inf)
        alpha = jax.nn.softmax(e, axis=-1)
        h = jnp.maximum(alpha @ hp + b, 0.0)
    return h


if __name__ == "__main__":
    key = jax.random.PRNGKey(0)

    # Small synthetic graph (module defaults scaled down).
    num_nodes = 200
    num_edges = 800
    in_channels = 64
    out_channels = 32
    k_layers = 2

    key, kx, ke = jax.random.split(key, 3)
    x = jax.random.normal(kx, (num_nodes, in_channels), dtype=jnp.float32)
    edge_index = jax.random.randint(ke, (2, num_edges), 0, num_nodes, dtype=jnp.int32)

    params = init_gat_params(key, in_channels, out_channels, k=k_layers)

    # Small tiles so the demo exercises both grid axes (4 row tiles x 2 source tiles).
    reps = encoder_forward(x, edge_index, params, tm=64, tn=128)
    reps = jax.block_until_ready(reps)

    ref = encoder_reference(x, edge_index, params)

    assert reps.shape == (num_nodes, out_channels), reps.shape
    assert bool(jnp.all(jnp.isfinite(reps)))
    assert float(jnp.max(jnp.abs(reps - ref))) < 2e-2
    print("KERNEL_OK")
</pallas_src>

<mosaic_0001>
module attributes {stable_mosaic.version = 11 : i64} {
  func.func @_gat_proj_kernel(%arg0: i32, %arg1: memref<64x64xf32, #tpu.memory_space<vmem>>, %arg2: memref<64x32xf32, #tpu.memory_space<vmem>>, %arg3: memref<32x2xf32, #tpu.memory_space<vmem>>, %arg4: memref<64x32xf32, #tpu.memory_space<vmem>>, %arg5: memref<64x2xf32, #tpu.memory_space<vmem>>) attributes {dimension_semantics = [#tpu.dimension_semantics<parallel>], iteration_bounds = array<i64: 4>, scalar_prefetch = 0 : i64, scratch_operands = 0 : i64, tpu.core_type = #tpu.core_type<tc>, window_params = [{transform_indices = @transform_0, window_bounds = array<i64: 64, 64>}, {pipeline_mode = #tpu.pipeline_mode<synchronous>, transform_indices = @transform_1, window_bounds = array<i64: 64, 32>}, {pipeline_mode = #tpu.pipeline_mode<synchronous>, transform_indices = @transform_2, window_bounds = array<i64: 32, 2>}, {transform_indices = @transform_3, window_bounds = array<i64: 64, 32>}, {transform_indices = @transform_4, window_bounds = array<i64: 64, 2>}]} {
    %c0 = arith.constant 0 : index
    %c0_0 = arith.constant 0 : index
    %0 = vector.load %arg1[%c0, %c0_0] : memref<64x64xf32, #tpu.memory_space<vmem>>, vector<64x64xf32>
    %c0_1 = arith.constant 0 : index
    %c0_2 = arith.constant 0 : index
    %1 = vector.load %arg2[%c0_1, %c0_2] : memref<64x32xf32, #tpu.memory_space<vmem>>, vector<64x32xf32>
    %cst = arith.constant dense<0.000000e+00> : vector<64x32xf32>
    %2 = tpu.matmul %0, %1, %cst {dimension_numbers = #tpu.dot_dimension_numbers<[1], [0], [0], [1], [0, 0, 1, 1], [], []>} : vector<64x64xf32>, vector<64x32xf32>, vector<64x32xf32> -> vector<64x32xf32>
    %c0_3 = arith.constant 0 : index
    %c0_4 = arith.constant 0 : index
    %3 = vector.load %arg4[%c0_3, %c0_4] : memref<64x32xf32, #tpu.memory_space<vmem>>, vector<64x32xf32>
    tpu.vector_store %arg4[%c0_3, %c0_4], %2 {strides = array<i32>} : memref<64x32xf32, #tpu.memory_space<vmem>>, vector<64x32xf32>,
    %c0_5 = arith.constant 0 : index
    %c0_6 = arith.constant 0 : index
    %4 = vector.load %arg3[%c0_5, %c0_6] : memref<32x2xf32, #tpu.memory_space<vmem>>, vector<32x2xf32>
    %cst_7 = arith.constant dense<0.000000e+00> : vector<64x2xf32>
    %5 = tpu.matmul %2, %4, %cst_7 {dimension_numbers = #tpu.dot_dimension_numbers<[1], [0], [0], [1], [0, 0, 1, 1], [], []>} : vector<64x32xf32>, vector<32x2xf32>, vector<64x2xf32> -> vector<64x2xf32>
    %c0_8 = arith.constant 0 : index
    %c0_9 = arith.constant 0 : index
    %6 = vector.load %arg5[%c0_8, %c0_9] : memref<64x2xf32, #tpu.memory_space<vmem>>, vector<64x2xf32>
    tpu.vector_store %arg5[%c0_8, %c0_9], %5 {strides = array<i32>} : memref<64x2xf32, #tpu.memory_space<vmem>>, vector<64x2xf32>,
    return
  }
  func.func @transform_0(%arg0: i32) -> (i32, i32) {
    %c0_i32 = arith.constant 0 : i32
    %c0_i32_0 = arith.constant 0 : i32
    return %arg0, %c0_i32 : i32, i32
  }
  func.func @transform_1(%arg0: i32) -> (i32, i32) {
    %c0_i32 = arith.constant 0 : i32
    %c0_i32_0 = arith.constant 0 : i32
    %c0_i32_1 = arith.constant 0 : i32
    return %c0_i32, %c0_i32_0 : i32, i32
  }
  func.func @transform_2(%arg0: i32) -> (i32, i32) {
    %c0_i32 = arith.constant 0 : i32
    %c0_i32_0 = arith.constant 0 : i32
    %c0_i32_1 = arith.constant 0 : i32
    return %c0_i32, %c0_i32_0 : i32, i32
  }
  func.func @transform_3(%arg0: i32) -> (i32, i32) {
    %c0_i32 = arith.constant 0 : i32
    %c0_i32_0 = arith.constant 0 : i32
    return %arg0, %c0_i32 : i32, i32
  }
  func.func @transform_4(%arg0: i32) -> (i32, i32) {
    %c0_i32 = arith.constant 0 : i32
    %c0_i32_0 = arith.constant 0 : i32
    return %arg0, %c0_i32 : i32, i32
  }
}

</mosaic_0001>

<bundles_post_ra>
// kernel: tpu_custom_call.1
= control target key start
LH: loop header
LB: loop body
LE: loop exit
PB: predicated region body
PF: predicated region fallthrough
CT: control target
= control target key end

     0   :  { %s556_s15 = smov 0   ;;  %s649_s0 = inlined_call_operand.vmem [shape: f32[256,64], index: 0, kind: input, shape index: {}]   ;;  %s650_s1 = inlined_call_operand.vmem [shape: f32[64,32], index: 1, kind: input, shape index: {}]   ;;  %s651_s2 = inlined_call_operand.vmem [shape: f32[32,2], index: 2, kind: input, shape index: {}]   ;;  %s652_s3 = inlined_call_operand.vmem [shape: f32[256,32], index: 3, kind: output, shape index: {0}]   ;;  %s653_s4 = inlined_call_operand.vmem [shape: f32[256,2], index: 4, kind: output, shape index: {1}]  }
   0x1 LB: > { %s474_s16 = sadd.s32 4294967295, %s529_s15   ;;  %p478_p0 = scmp.ge.s32.totalorder %s529_s15, 1  ;;  %s529_s15 = sphi %s556_s15, %s15_s15  }
   0x2   : > { %p166_p1 = scmp.lt.s32.totalorder %s529_s15, 5 }
   0x4   : > { %p167_p2 = pnand %p478_p0, %p166_p1 }
   0x5   : > { %s479_s21 = sshll.u32 (!%p167_p2), %s474_s16, 3 }
   0x6   : > { %170 = sbr.rel (%p167_p2) target bundleno = 316 (0x13c), region = 32  ;;  %p198_p3 = scmp.lt.s32.totalorder (!%p167_p2), %s479_s21, 31 }
   0xb   : > { %v230_v0 = vld [vmem:[%s650_s1 + $0x38] sm:$0xff]  ;;  %v229_v1 = vld [vmem:[%s650_s1 + $0x30] sm:$0xff]  ;;  %v228_v2 = vld [vmem:[%s650_s1 + $0x28] sm:$0xff]  ;;  %s655_s21 = smov (!%p198_p3, %s479_s21), 31  ;;  %vm231_vm0 = vcmask 523264   ;;  %vm297_vm1 = vcmask 261120  }
   0xc   : > { %264 = vmatpush.msra.mxu0 %v230_v0  ;;  %503 = vmatpush.msra.mxu2 %v230_v0  ;;  %v227_v3 = vld [vmem:[%s650_s1 + $0x20] sm:$0xff]  ;;  %v226_v4 = vld [vmem:[%s650_s1 + $0x18] sm:$0xff]  ;;  %s579_s28 = sshll.u32 %s655_s21, 3  ;;  %v225_v5 = vld [vmem:[%s650_s1 + $0x10] sm:$0xff]  ;;  %vm375_vm2 = vcmask 15360  }
   0xd   : > { %v309_v6 = vld [vmem:[%s651_s2 + $0x18] sm:$0xff]  ;;  %v224_v7 = vld [vmem:[%s650_s1 + $0x8] sm:$0xff]  ;;  %s201_s11 = scalar_lea.vmem %s649_s0, %s579_s28  ;;  %v308_v8 = vld [vmem:[%s651_s2 + $0x10] sm:$0xff]  ;;  %s207_s23 = scalar_lea.vmem %s652_s3, %s579_s28 }
   0xe   : > { %265 = vmatpush.msra.mxu0 %v229_v1  ;;  %504 = vmatpush.msra.mxu2 %v229_v1  ;;  %v307_v9 = vld [vmem:[%s651_s2 + $0x8] sm:$0xff]  ;;  %v223_v10 = vld [vmem:[%s650_s1] sm:$0xff]  ;;  %v217_v15 = vld [vmem:[%s201_s11 + $0x10] sm:$0xff]  ;;  %s213_s26 = scalar_lea.vmem %s653_s4, %s579_s28 }
   0xf   : > { %346 = vmatpush.msra.mxu1 %v309_v6  ;;  %511 = vmatpush.msra.mxu3 %v309_v6  ;;  %v215_v11 = vld [vmem:[%s201_s11] sm:$0xff]  ;;  %v216_v13 = vld [vmem:[%s201_s11 + $0x8] sm:$0xff]  ;;  %v221_v16 = vld [vmem:[%s201_s11 + $0x30] sm:$0xff] }
  0x10   : > { %266 = vmatpush.msra.mxu0 %v228_v2  ;;  %505 = vmatpush.msra.mxu2 %v228_v2  ;;  %v219_v12 = vld [vmem:[%s201_s11 + $0x20] sm:$0xff]  ;;  %v220_v14 = vld [vmem:[%s201_s11 + $0x28] sm:$0xff]  ;;  %v218_v17 = vld [vmem:[%s201_s11 + $0x18] sm:$0xff] }
  0x11   : > { %347 = vmatpush.msra.mxu1 %v308_v8  ;;  %512 = vmatpush.msra.mxu3 %v308_v8  ;;  %v222_v18 = vld [vmem:[%s201_s11 + $0x38] sm:$0xff]  ;;  %v306_v19 = vld [vmem:[%s651_s2] sm:$0xff] }
  0x12   : > { %267 = vmatpush.msra.mxu0 %v227_v3  ;;  %506 = vmatpush.msra.mxu2 %v227_v3 }
  0x13   : > { %348 = vmatpush.msra.mxu1 %v307_v9  ;;  %513 = vmatpush.msra.mxu3 %v307_v9 }
  0x14   : > { %268 = vmatpush.msra.mxu0 %v226_v4  ;;  %507 = vmatpush.msra.mxu2 %v226_v4 }
  0x15   : > { %349 = vmatpush.msra.mxu1 %v306_v19  ;;  %514 = vmatpush.msra.mxu3 %v306_v19 }
  0x16   : > { %269 = vmatpush.msra.mxu0 %v225_v5  ;;  %508 = vmatpush.msra.mxu2 %v225_v5 }
  0x18   : > { %270 = vmatpush.msra.mxu0 %v224_v7  ;;  %509 = vmatpush.msra.mxu2 %v224_v7 }
  0x1a   : > { %271 = vmatpush.msra.mxu0 %v223_v10  ;;  %510 = vmatpush.msra.mxu2 %v223_v10 }
  0x1b   : > { %485 = vmatmul.msk.f32.vlgmr.msra.gmra.mxu0 %vm231_vm0, %v215_v11  ;;  %489 = vmatmul.msk.f32.vlgmr.msra.gmra.mxu2 %vm231_vm0, %v219_v12 }
  0x23   : > { %486 = vmatmul.msk.f32.gmra.mxu0 %vm231_vm0, %v216_v13  ;;  %490 = vmatmul.msk.f32.gmra.mxu2 %vm231_vm0, %v220_v14 }
  0x2b   : > { %487 = vmatmul.msk.f32.gmra.mxu0 %vm231_vm0, %v217_v15  ;;  %491 = vmatmul.msk.f32.gmra.mxu2 %vm231_vm0, %v221_v16 }
  0x33   : > { %488 = vmatmul.msk.f32.gmra.mxu0 %vm231_vm0, %v218_v17  ;;  %492 = vmatmul.msk.f32.gmra.mxu2 %vm231_vm0, %v222_v18 }
  0x98   : > { %v273_v20 = vpop.f32.mrf.mxu0 }
  0x99   : > { %298 = vst.msk [vmem:[%s207_s23] sm:$0xff] %vm297_vm1, %v273_v20  ;;  %493 = vmatmul.msk.f32.vlgmr.msra.gmra.mxu1 %vm297_vm1, %v273_v20 }
  0x9e   : > { %v285_v21 = vpop.f32.mrf.mxu2 }
  0x9f   : > { %302 = vst.msk [vmem:[%s207_s23 + $0x20] sm:$0xff] %vm297_vm1, %v285_v21 }
  0xa0   : > { %v276_v22 = vpop.f32.mrf.mxu0 }
  0xa1   : > { %299 = vst.msk [vmem:[%s207_s23 + $0x8] sm:$0xff] %vm297_vm1, %v276_v22  ;;  %494 = vmatmul.msk.f32.gmra.mxu1 %vm297_vm1, %v276_v22 }
  0xa6   : > { %v288_v23 = vpop.f32.mrf.mxu2 }
  0xa7   : > { %303 = vst.msk [vmem:[%s207_s23 + $0x28] sm:$0xff] %vm297_vm1, %v288_v23  ;;  %498 = vmatmul.msk.f32.vlgmr.msra.gmra.mxu3 %vm297_vm1, %v288_v23 }
  0xa8   : > { %v279_v24 = vpop.f32.mrf.mxu0 }
  0xa9   : > { %300 = vst.msk [vmem:[%s207_s23 + $0x10] sm:$0xff] %vm297_vm1, %v279_v24  ;;  %495 = vmatmul.msk.f32.gmra.mxu1 %vm297_vm1, %v279_v24 }
  0xae   : > { %v291_v25 = vpop.f32.mrf.mxu2 }
  0xaf   : > { %304 = vst.msk [vmem:[%s207_s23 + $0x30] sm:$0xff] %vm297_vm1, %v291_v25  ;;  %499 = vmatmul.msk.f32.gmra.mxu3 %vm297_vm1, %v291_v25 }
  0xb0   : > { %v282_v26 = vpop.f32.mrf.mxu0 }
  0xb1   : > { %301 = vst.msk [vmem:[%s207_s23 + $0x18] sm:$0xff] %vm297_vm1, %v282_v26  ;;  %496 = vmatmul.msk.f32.gmra.mxu1 %vm297_vm1, %v282_v26 }
  0xb6   : > { %v294_v27 = vpop.f32.mrf.mxu2 }
  0xb7   : > { %305 = vst.msk [vmem:[%s207_s23 + $0x38] sm:$0xff] %vm297_vm1, %v294_v27  ;;  %500 = vmatmul.msk.f32.gmra.mxu3 %vm297_vm1, %v294_v27 }
  0xb9   : > { %497 = vmatmul.msk.f32.gmra.mxu1 %vm297_vm1, %v285_v21 }
 0x116   : > { %v351_v28 = vpop.f32.mrf.mxu1 }
 0x117   : > { %376 = vst.msk [vmem:[%s213_s26] sm:$0xff] %vm375_vm2, %v351_v28 }
 0x11e   : > { %v354_v29 = vpop.f32.mrf.mxu1 }
 0x11f   : > { %377 = vst.msk [vmem:[%s213_s26 + $0x8] sm:$0xff] %vm375_vm2, %v354_v29 }
 0x126   : > { %v357_v30 = vpop.f32.mrf.mxu1 }
 0x127   : > { %378 = vst.msk [vmem:[%s213_s26 + $0x10] sm:$0xff] %vm375_vm2, %v357_v30 }
 0x12a   : > { %v366_v31 = vpop.f32.mrf.mxu3 }
 0x12b   : > { %381 = vst.msk [vmem:[%s213_s26 + $0x28] sm:$0xff] %vm375_vm2, %v366_v31 }
 0x12e   : > { %v360_v32 = vpop.f32.mrf.mxu1 }
 0x12f   : > { %379 = vst.msk [vmem:[%s213_s26 + $0x18] sm:$0xff] %vm375_vm2, %v360_v32 }
 0x132   : > { %v369_v33 = vpop.f32.mrf.mxu3 }
 0x133   : > { %382 = vst.msk [vmem:[%s213_s26 + $0x30] sm:$0xff] %vm375_vm2, %v369_v33 }
 0x136   : > { %v363_v34 = vpop.f32.mrf.mxu1 }
 0x137   : > { %380 = vst.msk [vmem:[%s213_s26 + $0x20] sm:$0xff] %vm375_vm2, %v363_v34 }
 0x13a   : > { %v372_v35 = vpop.f32.mrf.mxu3 }
 0x13b   : > { %383 = vst.msk [vmem:[%s213_s26 + $0x38] sm:$0xff] %vm375_vm2, %v372_v35 }
 0x13c PF: > { %s15_s15 = sadd.s32 1, %s529_s15  }
 0x13d   : > { %p12_p4 = scmp.ge.s32.totalorder %s15_s15, 6  }
 0x13f   :  { %14 = sbr.rel (!%p12_p4) target bundleno = 1 (0x1), region = 74 }

</bundles_post_ra>
